<compile_context>
chip_gen: v7x
topology: tpu7x:2x2x1
jax: 0.10.0
libtpu: 0.0.40
codegen_flags: <defaults>
</compile_context>

<pallas_src>
import jax
import jax.numpy as jnp
from jax.experimental import pallas as pl
from jax.experimental.pallas import tpu as pltpu


def mlp_kernel(x_ref, w1_ref, b1_ref, w2_ref, b2_ref, o_ref):
    # x_ref : (1, Bp)  activations, batch on the lane axis (lane-dense)
    # w1_ref: (H, 1)   hidden-layer weights (n_feature == 1)
    # b1_ref: (H, 1)   hidden-layer bias
    # w2_ref: (H, 1)   output-layer weights (n_output == 1)
    # b2_ref: (1,)     output-layer bias, scalar in SMEM
    # o_ref : (1, Bp)  output, lane-dense
    #
    # hidden[h, b] = relu(w1[h] * x[b] + b1[h])          -- VPU broadcast mul/add
    h = jnp.maximum(w1_ref[...] * x_ref[...] + b1_ref[...], 0.0)        # (H, Bp)
    # out[b] = sum_h hidden[h, b] * w2[h] + b2           -- VPU mul + XLU sublane reduce
    y = jnp.sum(h * w2_ref[...], axis=0, keepdims=True) + b2_ref[0]     # (1, Bp)
    o_ref[...] = y.astype(o_ref.dtype)


def _round_up(n, m):
    return ((n + m - 1) // m) * m


def net_forward(x, w1, b1, w2, b2):
    """Forward pass of Net (specialized for n_feature == 1, n_output == 1).

    x : (B, 1) float32
    w1: (1, H), b1: (H,)   -> hidden = relu(x @ w1 + b1)
    w2: (H, 1), b2: (1,)   -> out    = hidden @ w2 + b2
    Returns (B, 1) float32, matching the PyTorch module.
    """
    B, F = x.shape
    H = w1.shape[1]
    O = w2.shape[1]
    assert F == 1 and O == 1, "lane-dense VPU kernel specialized for n_feature=1, n_output=1"
    # TODO(synk): for large n_feature/n_output add a batch grid + MXU dots with resident weights.

    # Lane-dense, aligned layout: batch on the 128-wide lane axis, padded to 128.
    Bp = _round_up(B, 128)
    x_lanes = jnp.zeros((1, Bp), jnp.float32).at[0, :B].set(x[:, 0])

    w1_col = w1.reshape(H, 1).astype(jnp.float32)   # broadcast along lanes in-kernel
    b1_col = b1.reshape(H, 1).astype(jnp.float32)
    w2_col = w2.reshape(H, 1).astype(jnp.float32)
    b2_s = b2.reshape(1).astype(jnp.float32)        # scalar -> SMEM

    out = pl.pallas_call(
        mlp_kernel,
        out_shape=jax.ShapeDtypeStruct((1, Bp), jnp.float32),
        in_specs=[
            pl.BlockSpec(memory_space=pltpu.MemorySpace.VMEM),   # x  (1, Bp)
            pl.BlockSpec(memory_space=pltpu.MemorySpace.VMEM),   # w1 (H, 1)
            pl.BlockSpec(memory_space=pltpu.MemorySpace.VMEM),   # b1 (H, 1)
            pl.BlockSpec(memory_space=pltpu.MemorySpace.VMEM),   # w2 (H, 1)
            pl.BlockSpec(memory_space=pltpu.MemorySpace.SMEM),   # b2 scalar
        ],
        out_specs=pl.BlockSpec(memory_space=pltpu.MemorySpace.VMEM),
    )(x_lanes, w1_col, b1_col, w2_col, b2_s)

    # Back to the PyTorch (B, 1) layout; drop lane padding.
    return out[0, :B].reshape(B, 1)


def init_params(key, n_feature, n_hidden, n_output):
    """Deterministic init mimicking torch.nn.Linear default U[-1/sqrt(fan_in), 1/sqrt(fan_in)].

    Weights are stored pre-transposed as [in, out]; biases as flat vectors.
    """
    k1, k2, k3, k4 = jax.random.split(key, 4)
    bound1 = 1.0 / jnp.sqrt(jnp.float32(n_feature))
    bound2 = 1.0 / jnp.sqrt(jnp.float32(n_hidden))
    w1 = jax.random.uniform(k1, (n_feature, n_hidden), jnp.float32, -bound1, bound1)
    b1 = jax.random.uniform(k2, (n_hidden,), jnp.float32, -bound1, bound1)
    w2 = jax.random.uniform(k3, (n_hidden, n_output), jnp.float32, -bound2, bound2)
    b2 = jax.random.uniform(k4, (n_output,), jnp.float32, -bound2, bound2)
    return w1, b1, w2, b2


if __name__ == "__main__":
    # Matches the script's usage: x = unsqueeze(linspace(-1, 1, 100), dim=1)
    # i.e. batch=100, n_feature=1.  Hidden=32, output=1.
    n_feature, n_hidden, n_output = 1, 32, 1
    batch = 100

    key = jax.random.PRNGKey(0)
    x = jnp.expand_dims(jnp.linspace(-1.0, 1.0, batch, dtype=jnp.float32), axis=1)
    w1, b1, w2, b2 = init_params(key, n_feature, n_hidden, n_output)

    out = net_forward(x, w1, b1, w2, b2)
    out = jax.block_until_ready(out)

    # Pure-JAX reference check (same math as torch: relu(x @ W1 + b1) @ W2 + b2).
    ref = jnp.maximum(x @ w1 + b1, 0.0) @ w2 + b2
    assert out.shape == (batch, n_output)
    assert jnp.allclose(out, ref, atol=1e-5, rtol=1e-5)

    print("KERNEL_OK")
</pallas_src>

<mosaic_0001>
module attributes {stable_mosaic.version = 11 : i64} {
  func.func @mlp_kernel(%arg0: memref<1x128xf32, #tpu.memory_space<vmem>>, %arg1: memref<32x1xf32, #tpu.memory_space<vmem>>, %arg2: memref<32x1xf32, #tpu.memory_space<vmem>>, %arg3: memref<32x1xf32, #tpu.memory_space<vmem>>, %arg4: memref<1xf32, #tpu.memory_space<smem>>, %arg5: memref<1x128xf32, #tpu.memory_space<vmem>>) attributes {dimension_semantics = [], scalar_prefetch = 0 : i64, scratch_operands = 0 : i64, tpu.core_type = #tpu.core_type<tc>} {
    %c0 = arith.constant 0 : index
    %c0_0 = arith.constant 0 : index
    %0 = vector.load %arg1[%c0, %c0_0] : memref<32x1xf32, #tpu.memory_space<vmem>>, vector<32x1xf32>
    %c0_1 = arith.constant 0 : index
    %c0_2 = arith.constant 0 : index
    %1 = vector.load %arg0[%c0_1, %c0_2] : memref<1x128xf32, #tpu.memory_space<vmem>>, vector<1x128xf32>
    %2 = vector.broadcast %0 : vector<32x1xf32> to vector<32x128xf32>
    %3 = vector.broadcast %1 : vector<1x128xf32> to vector<32x128xf32>
    %4 = arith.mulf %2, %3 : vector<32x128xf32>
    %c0_3 = arith.constant 0 : index
    %c0_4 = arith.constant 0 : index
    %5 = vector.load %arg2[%c0_3, %c0_4] : memref<32x1xf32, #tpu.memory_space<vmem>>, vector<32x1xf32>
    %6 = vector.broadcast %5 : vector<32x1xf32> to vector<32x128xf32>
    %7 = arith.addf %4, %6 : vector<32x128xf32>
    %cst = arith.constant 0.000000e+00 : f32
    %8 = vector.broadcast %cst : f32 to vector<32x128xf32>
    %9 = arith.maximumf %7, %8 : vector<32x128xf32>
    %c0_5 = arith.constant 0 : index
    %c0_6 = arith.constant 0 : index
    %10 = vector.load %arg3[%c0_5, %c0_6] : memref<32x1xf32, #tpu.memory_space<vmem>>, vector<32x1xf32>
    %11 = vector.broadcast %10 : vector<32x1xf32> to vector<32x128xf32>
    %12 = arith.mulf %9, %11 : vector<32x128xf32>
    %cst_7 = arith.constant dense<0.000000e+00> : vector<128xf32>
    %13 = vector.multi_reduction <add>, %12, %cst_7 [0] : vector<32x128xf32> to vector<128xf32>
    %14 = vector.shape_cast %13 : vector<128xf32> to vector<1x128xf32>
    %c0_8 = arith.constant 0 : index
    %15 = memref.load %arg4[%c0_8] : memref<1xf32, #tpu.memory_space<smem>>
    %16 = vector.broadcast %15 : f32 to vector<1x128xf32>
    %17 = arith.addf %14, %16 : vector<1x128xf32>
    %c0_9 = arith.constant 0 : index
    %c0_10 = arith.constant 0 : index
    %18 = vector.load %arg5[%c0_9, %c0_10] : memref<1x128xf32, #tpu.memory_space<vmem>>, vector<1x128xf32>
    tpu.vector_store %arg5[%c0_9, %c0_10], %17 {strides = array<i32>} : memref<1x128xf32, #tpu.memory_space<vmem>>, vector<1x128xf32>,
    return
  }
}

</mosaic_0001>

<bundles_post_ra>
// kernel: tpu_custom_call.1
= control target key start
LH: loop header
LB: loop body
LE: loop exit
PB: predicated region body
PF: predicated region fallthrough
CT: control target
= control target key end

     0   :  { %v173_v2 = vmov 0   ;;  %s259_s0 = inlined_call_operand.vmem [shape: f32[1,128], index: 0, kind: input, shape index: {}]   ;;  %s260_s1 = inlined_call_operand.vmem [shape: f32[32,1], index: 1, kind: input, shape index: {}]   ;;  %s261_s2 = inlined_call_operand.vmem [shape: f32[32,1], index: 2, kind: input, shape index: {}]   ;;  %s262_s3 = inlined_call_operand.vmem [shape: f32[32,1], index: 3, kind: input, shape index: {}]   ;;  %s263_s4 = inlined_call_operand.<no memory space> [shape: f32[1], index: 4, kind: input, shape index: {}]   ;;  %s264_s5 = inlined_call_operand.hbm [shape: f32[1,128], index: 5, kind: output, shape index: {}]  }
   0x1   :  { %v24_v0 = vld [vmem:[%s260_s1 + $0x10] sm:$0xff]  ;;  %v22_v1 = vld [vmem:[%s260_s1] sm:$0xff]  ;;  %148 = vset.pattern.permute.xlu1 %v173_v2  ;;  %147 = vset.pattern.permute.xlu0 %v173_v2  ;;  %v23_v4 = vld [vmem:[%s260_s1 + $0x8] sm:$0xff] }
   0x2   :  { %39 = vperm.xlu1 %148, %v24_v0   ;;  %29 = vperm.xlu0 %147, %v22_v1   ;;  %v57_v3 = vld [vmem:[%s261_s2] sm:$0xff] }
   0x3   :  { %11 = vsyncpa [#allocation4], 0  ;;  %v25_v5 = vld [vmem:[%s260_s1 + $0x18] sm:$0xff]  ;;  %v58_v6 = vld [vmem:[%s261_s2 + $0x8] sm:$0xff]  ;;  %v127_v50 = vstv %s263_s4  ;;  %s174_s17 = smov [#allocation3]  }
   0x4   :  { %v60_v7 = vld [vmem:[%s261_s2 + $0x18] sm:$0xff]  ;;  %v59_v8 = vld [vmem:[%s261_s2 + $0x10] sm:$0xff]  ;;  %v90_v9 = vld [vmem:[%s262_s3 + $0x8] sm:$0xff]  ;;  %s136_s18 = sshll.u32 %s174_s17, 4  ;;  %s137_s18 = int_to_ptr.vmem [resolvable:$true] %s136_s18 }
   0x5   :  { %v89_v10 = vld [vmem:[%s262_s3] sm:$0xff]  ;;  %v92_v11 = vld [vmem:[%s262_s3 + $0x18] sm:$0xff]  ;;  %v91_v12 = vld [vmem:[%s262_s3 + $0x10] sm:$0xff]  ;;  %s149_s19 = scalar_lea.vmem %s137_s18, 16  ;;  %s153_s20 = scalar_lea.vmem %s137_s18, 32 }
   0x6   :  { %63 = vperm.xlu1 %148, %v57_v3   ;;  %34 = vperm.xlu0 %147, %v23_v4   ;;  %v144_v17 = vld [vmem:[%s259_s0] ss:$0 sm:$0xff]  ;;  %p150_p0 = scmp.ne.s32.totalorder %s137_s18, %s149_s19  ;;  %p154_p1 = scmp.lt.s32.totalorder %s137_s18, %s137_s18 }
   0x7   :  { %p155_p2 = scmp.lt.s32.totalorder %s153_s20, %s149_s19 }
   0x9   :  { %p156_p3 = por %p155_p2, %p154_p1 }
   0xa   :  { %44 = vperm.xlu1 %148, %v25_v5   ;;  %68 = vperm.xlu0 %147, %v58_v6  }
   0xb   :  { %p157_p4 = pnand %p156_p3, %p150_p0 }
   0xe   :  { %78 = vperm.xlu1 %148, %v60_v7   ;;  %73 = vperm.xlu0 %147, %v59_v8  }
  0x12   :  { %100 = vperm.xlu1 %148, %v90_v9   ;;  %95 = vperm.xlu0 %147, %v89_v10  }
  0x16   :  { %110 = vperm.xlu1 %148, %v92_v11   ;;  %105 = vperm.xlu0 %147, %v91_v12  }
  0x81   :  { %v40_v13 = vpop.permute.xlu1 %39  ;;  %v30_v14 = vpop.permute.xlu0 %29 }
  0x82   :  { %v53_v20 = vmul.f32 %v144_v17, %v30_v14  ;;  %v55_v26 = vmul.f32 %v144_v17, %v40_v13 }
  0x85   :  { %v64_v15 = vpop.permute.xlu1 %63  ;;  %v35_v16 = vpop.permute.xlu0 %34 }
  0x86   :  { %v54_v21 = vmul.f32 %v144_v17, %v35_v16  ;;  %v81_v22 = vadd.f32 %v64_v15, %v53_v20 }
  0x88   :  { %v85_v27 = vmax.f32 %v81_v22, 0.0 }
  0x89   :  { %v45_v18 = vpop.permute.xlu1 %44  ;;  %v69_v19 = vpop.permute.xlu0 %68 }
  0x8a   :  { %v82_v23 = vadd.f32 %v69_v19, %v54_v21  ;;  %v56_v28 = vmul.f32 %v144_v17, %v45_v18 }
  0x8c   :  { %v86_v29 = vmax.f32 %v82_v23, 0.0 }
  0x8d   :  { %v79_v24 = vpop.permute.xlu1 %78  ;;  %v74_v25 = vpop.permute.xlu0 %73 }
  0x8e   :  { %v83_v30 = vadd.f32 %v74_v25, %v55_v26  ;;  %v84_v33 = vadd.f32 %v79_v24, %v56_v28 }
  0x90   :  { %v87_v36 = vmax.f32 %v83_v30, 0.0  ;;  %v88_v39 = vmax.f32 %v84_v33, 0.0 }
  0x91   :  { %v101_v31 = vpop.permute.xlu1 %100  ;;  %v96_v32 = vpop.permute.xlu0 %95 }
  0x92   :  { %v114_v34 = vmul.f32 %v101_v31, %v86_v29  ;;  %v113_v35 = vmul.f32 %v96_v32, %v85_v27 }
  0x94   :  { %v117_v40 = vadd.f32 %v114_v34, %v113_v35 }
  0x95   :  { %v111_v37 = vpop.permute.xlu1 %110  ;;  %v106_v38 = vpop.permute.xlu0 %105 }
  0x96   :  { %v115_v41 = vmul.f32 %v106_v38, %v87_v36  ;;  %v116_v42 = vmul.f32 %v111_v37, %v88_v39 }
  0x98   :  { %v118_v43 = vadd.f32 %v117_v40, %v115_v41 }
  0x9a   :  { %v119_v44 = vadd.f32 %v118_v43, %v116_v42 }
  0x9c   :  { %v120_v45 = vrot.slane %v119_v44, 4 }
  0x9e   :  { %v121_v46 = vadd.f32 %v120_v45, %v119_v44 }
  0xa0   :  { %v122_v47 = vrot.slane %v121_v46, 2 }
  0xa2   :  { %v123_v48 = vadd.f32 %v122_v47, %v121_v46 }
  0xa4   :  { %v124_v49 = vrot.slane %v123_v48, 1 }
  0xa6   :  { %v125_v51 = vadd.f32 %v124_v49, %v123_v48 }
  0xa8   :  { %v128_v52 = vadd.f32 %v127_v50, %v125_v51 }
  0xaa   :  { %129 = vst [vmem:[#allocation3] sm:$0x1] %v128_v52 }
  0xab   :  { %160 = shalt.err (!%p157_p4)
}
  0xac   :  { %s161_s23 = scalar_lea.hbm %s264_s5, 16 }
  0xad   :  { %p162_p5 = scmp.ne.s32.totalorder %s264_s5, %s161_s23  ;;  %p165_p6 = scmp.lt.u32.totalorder %s161_s23, %s264_s5 }
  0xaf   :  { %p167_p7 = pnand %p165_p6, %p162_p5 }
  0xb1   :  { %170 = shalt.err (!%p167_p7)
}
  0xb2   :  { %139 = dma.vmem_to_hbm [thread:$0]  %s137_s18, 16, %s264_s5, [#allocation4]  }
  0xb3   :  { %171 = dma.done.wait [#allocation4], 16  }
  0xb4   :  { %172 = vsyncadd [#allocation4], 4294967280 }
  0xb5   :  { %143 = vsyncpa [#allocation4], 1 }

</bundles_post_ra>
